<compile_context>
chip_gen: v7x
topology: tpu7x:2x2x1
jax: 0.10.0
libtpu: 0.0.40
codegen_flags: <defaults>
</compile_context>

<pallas_src>
import jax
import jax.numpy as jnp
from jax.experimental import pallas as pl
from jax.experimental.pallas import tpu as pltpu

HIDDEN = 30 * 8          # 240, as in the PyTorch module
HIDDEN_PAD = 256         # padded to a clean multiple of 128 lanes
BN_EPS = 1e-5
LANE = 128
VMEM_BUDGET = 40 * 1024 * 1024   # conservative: fits v7x's 64 MiB physical VMEM
VMEM_LIMIT = 48 * 1024 * 1024    # scoped VMEM limit handed to Mosaic


def _round_up(n, m):
    return ((n + m - 1) // m) * m


def _decoder_kernel(x_ref, w1_ref, b1_ref, w3_ref, b3_ref, o_ref):
    # x_ref:  (TB, D_in)        f32  (cast to bf16 in-kernel, free on VPU)
    # w1_ref: (D_in, H_PAD)     bf16 (BN folded in)
    # b1_ref: (1, H_PAD)        f32  (BN folded in)
    # w3_ref: (H_PAD, OUT_PAD)  bf16
    # b3_ref: (1, OUT_PAD)      f32
    # o_ref:  (TB, OUT_PAD)     bf16
    x = x_ref[...].astype(jnp.bfloat16)

    # fc1 + folded BN bias, then relu (f32 accumulate, f32 elementwise).
    h = jnp.dot(x, w1_ref[...], preferred_element_type=jnp.float32) + b1_ref[...]
    h = jnp.maximum(h, 0.0)

    # dropout: identity in eval mode.

    # fc3 (bf16 MXU operands, f32 accumulate).
    y = jnp.dot(h.astype(jnp.bfloat16), w3_ref[...],
                preferred_element_type=jnp.float32) + b3_ref[...]

    # sigmoid via a single EUP tanh: sigmoid(y) = 0.5 * tanh(0.5*y) + 0.5
    o_ref[...] = (0.5 * jnp.tanh(0.5 * y) + 0.5).astype(o_ref.dtype)


def prepare_decoder_params(params):
    """One-time parameter prep: fold BN into fc1, pad to lane-friendly shapes,
    cast MXU operands to bf16. Do this once when params are loaded and reuse."""
    w1, b1, gamma, beta, mean, var, w3, b3 = params
    out_dim = w3.shape[1]
    out_pad = _round_up(out_dim, LANE)
    hpad = HIDDEN_PAD - HIDDEN

    # Fold BatchNorm (running stats, eval mode) into fc1 weight/bias (f32 math).
    scale = gamma * jax.lax.rsqrt(var + BN_EPS)          # (1, HIDDEN)
    w1f = w1 * scale                                     # (d_in, HIDDEN)
    b1f = (b1 - mean) * scale + beta                     # (1, HIDDEN)

    # Pad hidden 240->256 and output to a multiple of 128 lanes (exact zeros).
    w1f = jnp.pad(w1f, ((0, 0), (0, hpad))).astype(jnp.bfloat16)          # (d_in, 256)
    b1f = jnp.pad(b1f, ((0, 0), (0, hpad))).astype(jnp.float32)           # (1, 256)
    w3f = jnp.pad(w3, ((0, hpad), (0, out_pad - out_dim))).astype(jnp.bfloat16)
    b3f = jnp.pad(b3, ((0, 0), (0, out_pad - out_dim))).astype(jnp.float32)
    return (w1f, b1f, w3f, b3f), out_dim


def _vmem_bytes(tb, d_in, out_pad):
    # double-buffered tiles + resident weights + in-kernel intermediates
    x_tile = tb * d_in * 4
    o_tile = tb * out_pad * 2
    weights = (d_in * HIDDEN_PAD * 2 + HIDDEN_PAD * out_pad * 2
               + HIDDEN_PAD * 4 + out_pad * 4)
    interm = tb * HIDDEN_PAD * (4 + 2) + tb * out_pad * 4
    return 2 * (x_tile + o_tile) + weights + interm


def liner_decoder(x, prepared, out_dim, *, max_tb=2048):
    """x: (B, input_dim) f32 -> (B, out_dim) bf16 (eval-mode forward).
    `prepared` comes from prepare_decoder_params()."""
    w1f, b1f, w3f, b3f = prepared
    B, d_in = x.shape
    out_pad = w3f.shape[1]

    # ---- Batch tile: big (amortize grid overhead), multiple of 16 (bf16 rows),
    #      and >= 2 grid steps when the batch allows it (v7x dual-TC sharding).
    if B > 16:
        TB = min(max_tb, _round_up(pl.cdiv(B, 2), 16))
    else:
        TB = _round_up(max(B, 1), 16)
    # ---- VMEM budget check (v7x has only 64 MiB physical VMEM).
    while TB > 16 and _vmem_bytes(TB, d_in, out_pad) > VMEM_BUDGET:
        TB = _round_up(TB // 2, 16)

    Bp = _round_up(B, TB)
    nb = Bp // TB
    # Pad the batch only when needed (no per-call astype pass over x).
    xp = x if Bp == B else jnp.pad(x, ((0, Bp - B), (0, 0)))
    xp = xp.astype(jnp.float32)   # no-op when x is already f32

    cost = pl.CostEstimate(
        flops=2 * Bp * (d_in * HIDDEN_PAD + HIDDEN_PAD * out_pad),
        transcendentals=Bp * out_pad,
        bytes_accessed=(Bp * d_in * 4 + Bp * out_pad * 2
                        + d_in * HIDDEN_PAD * 2 + HIDDEN_PAD * out_pad * 2
                        + HIDDEN_PAD * 4 + out_pad * 4),
    )

    out = pl.pallas_call(
        _decoder_kernel,
        out_shape=jax.ShapeDtypeStruct((Bp, out_pad), jnp.bfloat16),
        grid=(nb,),
        in_specs=[
            pl.BlockSpec((TB, d_in), lambda i: (i, 0)),              # x: batch-tiled
            pl.BlockSpec((d_in, HIDDEN_PAD), lambda i: (0, 0)),      # W1': resident
            pl.BlockSpec((1, HIDDEN_PAD), lambda i: (0, 0)),         # b1': resident
            pl.BlockSpec((HIDDEN_PAD, out_pad), lambda i: (0, 0)),   # W3: resident
            pl.BlockSpec((1, out_pad), lambda i: (0, 0)),            # b3: resident
        ],
        out_specs=pl.BlockSpec((TB, out_pad), lambda i: (i, 0)),
        compiler_params=pltpu.CompilerParams(
            dimension_semantics=("parallel",),
            vmem_limit_bytes=VMEM_LIMIT),
        cost_estimate=cost,
    )(xp, w1f, b1f, w3f, b3f)

    return out[:B, :out_dim]


def init_params(key, input_dim, output_dim):
    """Deterministic synthetic parameters matching the PyTorch module's shapes."""
    ks = jax.random.split(key, 8)
    # fc1: Linear(input_dim, 240) -> stored transposed (input_dim, 240)
    lim1 = 1.0 / jnp.sqrt(input_dim)
    w1 = jax.random.uniform(ks[0], (input_dim, HIDDEN), jnp.float32, -lim1, lim1)
    b1 = jax.random.uniform(ks[1], (1, HIDDEN), jnp.float32, -lim1, lim1)
    # bn1: BatchNorm1d(240) — affine params + running stats
    gamma = 1.0 + 0.1 * jax.random.normal(ks[2], (1, HIDDEN), jnp.float32)
    beta = 0.1 * jax.random.normal(ks[3], (1, HIDDEN), jnp.float32)
    mean = 0.1 * jax.random.normal(ks[4], (1, HIDDEN), jnp.float32)
    var = jnp.abs(1.0 + 0.1 * jax.random.normal(ks[5], (1, HIDDEN), jnp.float32))
    # fc3: Linear(240, output_dim) -> stored transposed (240, output_dim)
    lim3 = 1.0 / jnp.sqrt(HIDDEN)
    w3 = jax.random.uniform(ks[6], (HIDDEN, output_dim), jnp.float32, -lim3, lim3)
    b3 = jax.random.uniform(ks[7], (1, output_dim), jnp.float32, -lim3, lim3)
    return (w1, b1, gamma, beta, mean, var, w3, b3)


def reference(x, params):
    """Plain-JAX f32 reference matching the PyTorch eval-mode forward."""
    w1, b1, gamma, beta, mean, var, w3, b3 = params
    h = x @ w1 + b1
    h = (h - mean) / jnp.sqrt(var + BN_EPS) * gamma + beta
    h = jnp.maximum(h, 0.0)
    y = h @ w3 + b3
    return jax.nn.sigmoid(y)


if __name__ == "__main__":
    key = jax.random.PRNGKey(0)
    kx, kp, kx2 = jax.random.split(key, 3)

    batch, input_dim, output_dim = 8, 32, 16
    params = init_params(kp, input_dim, output_dim)
    prepared, out_dim = prepare_decoder_params(params)   # one-time weight prep

    # Case 1: tiny batch (single tile).
    x = jax.random.normal(kx, (batch, input_dim), jnp.float32)
    out = jax.block_until_ready(liner_decoder(x, prepared, out_dim))
    ref = reference(x, params)
    assert out.shape == (batch, output_dim)
    assert jnp.allclose(out.astype(jnp.float32), ref, atol=2e-2, rtol=2e-2), \
        "mismatch vs reference (case 1)"

    # Case 2: batch not a multiple of the tile (exercises padding + 2-tile grid).
    x2 = jax.random.normal(kx2, (37, input_dim), jnp.float32)
    out2 = jax.block_until_ready(liner_decoder(x2, prepared, out_dim))
    ref2 = reference(x2, params)
    assert out2.shape == (37, output_dim)
    assert jnp.allclose(out2.astype(jnp.float32), ref2, atol=2e-2, rtol=2e-2), \
        "mismatch vs reference (case 2)"

    print("KERNEL_OK")
</pallas_src>

<mosaic_0001>
module attributes {stable_mosaic.version = 11 : i64} {
  func.func @_decoder_kernel(%arg0: i32, %arg1: memref<16x32xf32, #tpu.memory_space<vmem>>, %arg2: memref<32x256xbf16, #tpu.memory_space<vmem>>, %arg3: memref<1x256xf32, #tpu.memory_space<vmem>>, %arg4: memref<256x128xbf16, #tpu.memory_space<vmem>>, %arg5: memref<1x128xf32, #tpu.memory_space<vmem>>, %arg6: memref<16x128xbf16, #tpu.memory_space<vmem>>) attributes {dimension_semantics = [#tpu.dimension_semantics<parallel>], iteration_bounds = array<i64: 1>, scalar_prefetch = 0 : i64, scratch_operands = 0 : i64, tpu.core_type = #tpu.core_type<tc>, window_params = [{transform_indices = @transform_0, window_bounds = array<i64: 16, 32>}, {pipeline_mode = #tpu.pipeline_mode<synchronous>, transform_indices = @transform_1, window_bounds = array<i64: 32, 256>}, {pipeline_mode = #tpu.pipeline_mode<synchronous>, transform_indices = @transform_2, window_bounds = array<i64: 1, 256>}, {pipeline_mode = #tpu.pipeline_mode<synchronous>, transform_indices = @transform_3, window_bounds = array<i64: 256, 128>}, {pipeline_mode = #tpu.pipeline_mode<synchronous>, transform_indices = @transform_4, window_bounds = array<i64: 1, 128>}, {transform_indices = @transform_5, window_bounds = array<i64: 16, 128>}]} {
    %c0 = arith.constant 0 : index
    %c0_0 = arith.constant 0 : index
    %0 = vector.load %arg1[%c0, %c0_0] : memref<16x32xf32, #tpu.memory_space<vmem>>, vector<16x32xf32>
    %1 = arith.truncf %0 : vector<16x32xf32> to vector<16x32xbf16>
    %c0_1 = arith.constant 0 : index
    %c0_2 = arith.constant 0 : index
    %2 = vector.load %arg2[%c0_1, %c0_2] : memref<32x256xbf16, #tpu.memory_space<vmem>>, vector<32x256xbf16>
    %cst = arith.constant dense<0.000000e+00> : vector<16x256xf32>
    %3 = tpu.matmul %1, %2, %cst {dimension_numbers = #tpu.dot_dimension_numbers<[1], [0], [0], [1], [0, 0, 1, 1], [], []>} : vector<16x32xbf16>, vector<32x256xbf16>, vector<16x256xf32> -> vector<16x256xf32>
    %c0_3 = arith.constant 0 : index
    %c0_4 = arith.constant 0 : index
    %4 = vector.load %arg3[%c0_3, %c0_4] : memref<1x256xf32, #tpu.memory_space<vmem>>, vector<1x256xf32>
    %5 = vector.broadcast %4 : vector<1x256xf32> to vector<16x256xf32>
    %6 = arith.addf %3, %5 : vector<16x256xf32>
    %cst_5 = arith.constant 0.000000e+00 : f32
    %7 = vector.broadcast %cst_5 : f32 to vector<16x256xf32>
    %8 = arith.maximumf %6, %7 : vector<16x256xf32>
    %9 = arith.truncf %8 : vector<16x256xf32> to vector<16x256xbf16>
    %c0_6 = arith.constant 0 : index
    %c0_7 = arith.constant 0 : index
    %10 = vector.load %arg4[%c0_6, %c0_7] : memref<256x128xbf16, #tpu.memory_space<vmem>>, vector<256x128xbf16>
    %cst_8 = arith.constant dense<0.000000e+00> : vector<16x128xf32>
    %11 = tpu.matmul %9, %10, %cst_8 {dimension_numbers = #tpu.dot_dimension_numbers<[1], [0], [0], [1], [0, 0, 1, 1], [], []>} : vector<16x256xbf16>, vector<256x128xbf16>, vector<16x128xf32> -> vector<16x128xf32>
    %c0_9 = arith.constant 0 : index
    %c0_10 = arith.constant 0 : index
    %12 = vector.load %arg5[%c0_9, %c0_10] : memref<1x128xf32, #tpu.memory_space<vmem>>, vector<1x128xf32>
    %13 = vector.broadcast %12 : vector<1x128xf32> to vector<16x128xf32>
    %14 = arith.addf %11, %13 : vector<16x128xf32>
    %cst_11 = arith.constant 5.000000e-01 : f32
    %15 = vector.broadcast %cst_11 : f32 to vector<16x128xf32>
    %16 = arith.mulf %15, %14 : vector<16x128xf32>
    %17 = math.tanh %16 : vector<16x128xf32>
    %cst_12 = arith.constant 5.000000e-01 : f32
    %18 = vector.broadcast %cst_12 : f32 to vector<16x128xf32>
    %19 = arith.mulf %18, %17 : vector<16x128xf32>
    %cst_13 = arith.constant 5.000000e-01 : f32
    %20 = vector.broadcast %cst_13 : f32 to vector<16x128xf32>
    %21 = arith.addf %19, %20 : vector<16x128xf32>
    %22 = arith.truncf %21 : vector<16x128xf32> to vector<16x128xbf16>
    %c0_14 = arith.constant 0 : index
    %c0_15 = arith.constant 0 : index
    %23 = vector.load %arg6[%c0_14, %c0_15] : memref<16x128xbf16, #tpu.memory_space<vmem>>, vector<16x128xbf16>
    tpu.vector_store %arg6[%c0_14, %c0_15], %22 {strides = array<i32>} : memref<16x128xbf16, #tpu.memory_space<vmem>>, vector<16x128xbf16>,
    return
  }
  func.func @transform_0(%arg0: i32) -> (i32, i32) {
    %c0_i32 = arith.constant 0 : i32
    %c0_i32_0 = arith.constant 0 : i32
    return %arg0, %c0_i32 : i32, i32
  }
  func.func @transform_1(%arg0: i32) -> (i32, i32) {
    %c0_i32 = arith.constant 0 : i32
    %c0_i32_0 = arith.constant 0 : i32
    %c0_i32_1 = arith.constant 0 : i32
    return %c0_i32, %c0_i32_0 : i32, i32
  }
  func.func @transform_2(%arg0: i32) -> (i32, i32) {
    %c0_i32 = arith.constant 0 : i32
    %c0_i32_0 = arith.constant 0 : i32
    %c0_i32_1 = arith.constant 0 : i32
    return %c0_i32, %c0_i32_0 : i32, i32
  }
  func.func @transform_3(%arg0: i32) -> (i32, i32) {
    %c0_i32 = arith.constant 0 : i32
    %c0_i32_0 = arith.constant 0 : i32
    %c0_i32_1 = arith.constant 0 : i32
    return %c0_i32, %c0_i32_0 : i32, i32
  }
  func.func @transform_4(%arg0: i32) -> (i32, i32) {
    %c0_i32 = arith.constant 0 : i32
    %c0_i32_0 = arith.constant 0 : i32
    %c0_i32_1 = arith.constant 0 : i32
    return %c0_i32, %c0_i32_0 : i32, i32
  }
  func.func @transform_5(%arg0: i32) -> (i32, i32) {
    %c0_i32 = arith.constant 0 : i32
    %c0_i32_0 = arith.constant 0 : i32
    return %arg0, %c0_i32 : i32, i32
  }
}

</mosaic_0001>

<bundles_post_ra>
// kernel: tpu_custom_call.1
= control target key start
LH: loop header
LB: loop body
LE: loop exit
PB: predicated region body
PF: predicated region fallthrough
CT: control target
= control target key end

     0   :  { %10 = vsyncpa [#allocation3], 0  ;;  %s655_s0 = inlined_call_operand.hbm [shape: f32[16,32], index: 0, kind: input, shape index: {}]   ;;  %s656_s1 = inlined_call_operand.hbm [shape: bf16[32,256], index: 1, kind: input, shape index: {}]   ;;  %s657_s2 = inlined_call_operand.vmem [shape: f32[1,256], index: 2, kind: input, shape index: {}]   ;;  %s658_s3 = inlined_call_operand.hbm [shape: bf16[256,128], index: 3, kind: input, shape index: {}]   ;;  %s659_s4 = inlined_call_operand.vmem [shape: f32[1,128], index: 4, kind: input, shape index: {}]   ;;  %s660_s5 = inlined_call_operand.hbm [shape: bf16[16,128], index: 5, kind: output, shape index: {}]  }
   0x1   :  { %11 = vsyncpa [#allocation6], 0 }
   0x2   :  { %12 = vsyncpa [#allocation4], 0  ;;  %s549_s18 = smov [#allocation5]   ;;  %s550_s20 = smov [#allocation2]  }
   0x3   :  { %s30_s19 = sshll.u32 %s549_s18, 4  ;;  %s18_s21 = sshll.u32 %s550_s20, 4  ;;  %s31_s19 = int_to_ptr.vmem [resolvable:$true] %s30_s19  ;;  %s588_s21 = int_to_ptr.vmem [resolvable:$true] %s18_s21 }
   0x4   :  { %s455_s24 = scalar_lea.hbm %s656_s1, 512 }
   0x5   :  { %p456_p0 = scmp.ne.s32.totalorder %s656_s1, %s455_s24  ;;  %p459_p1 = scmp.lt.u32.totalorder %s455_s24, %s656_s1 }
   0x7   :  { %p461_p2 = pnand %p459_p1, %p456_p0 }
   0x9   :  { %464 = shalt.err (!%p461_p2)
}
   0xa   :  { %s465_s29 = scalar_lea.vmem %s31_s19, 512  ;;  %p470_p4 = scmp.lt.s32.totalorder %s31_s19, %s31_s19 }
   0xb   :  { %p466_p3 = scmp.ne.s32.totalorder %s31_s19, %s465_s29  ;;  %p471_p5 = scmp.lt.s32.totalorder %s465_s29, %s465_s29 }
   0xd   :  { %p472_p6 = por %p471_p5, %p470_p4 }
   0xf   :  { %p473_p7 = pnand %p472_p6, %p466_p3 }
  0x11   :  { %476 = shalt.err (!%p473_p7)
}
  0x12   :  { %s551_s30 = smov 128   ;;  %s552_s6 = smov 8  }
  0x13   :  { %36 = dma.hbm_to_vmem [thread:$0]  %s656_s1, 512, %s31_s19, [#allocation6], %s551_s30, %s551_s30, %s552_s6  }
  0x14   :  { %s477_s11 = scalar_lea.hbm %s655_s0, 256 }
  0x15   :  { %p478_p8 = scmp.ne.s32.totalorder %s655_s0, %s477_s11  ;;  %p481_p9 = scmp.lt.u32.totalorder %s477_s11, %s655_s0 }
  0x17   :  { %p483_p10 = pnand %p481_p9, %p478_p8 }
  0x19   :  { %486 = shalt.err (!%p483_p10)
}
  0x1a   :  { %s487_s16 = scalar_lea.vmem %s588_s21, 256  ;;  %p492_p12 = scmp.lt.s32.totalorder %s588_s21, %s588_s21 }
  0x1b   :  { %p488_p11 = scmp.ne.s32.totalorder %s588_s21, %s487_s16  ;;  %p493_p13 = scmp.lt.s32.totalorder %s487_s16, %s487_s16 }
  0x1d   :  { %p494_p0 = por %p493_p13, %p492_p12 }
  0x1f   :  { %p495_p1 = pnand %p494_p0, %p488_p11 }
  0x21   :  { %498 = shalt.err (!%p495_p1)
}
  0x22   :  { %24 = dma.hbm_to_vmem [thread:$0]  %s655_s0, 256, %s588_s21, [#allocation3], %s551_s30, %s551_s30, %s552_s6  }
  0x23   :  { %s553_s18 = smov [#allocation7]   ;;  %s499_s23 = scalar_lea.hbm %s658_s3, 2048 }
  0x24   :  { %s44_s19 = sshll.u32 %s553_s18, 4  ;;  %p500_p2 = scmp.ne.s32.totalorder %s658_s3, %s499_s23  ;;  %s45_s19 = int_to_ptr.vmem [resolvable:$true] %s44_s19 }
  0x25   :  { %p503_p3 = scmp.lt.u32.totalorder %s499_s23, %s658_s3 }
  0x27   :  { %p505_p4 = pnand %p503_p3, %p500_p2 }
  0x29   :  { %508 = shalt.err (!%p505_p4)
}
  0x2a   :  { %s509_s28 = scalar_lea.vmem %s45_s19, 2048  ;;  %p514_p6 = scmp.lt.s32.totalorder %s45_s19, %s45_s19 }
  0x2b   :  { %p510_p5 = scmp.ne.s32.totalorder %s45_s19, %s509_s28  ;;  %p515_p7 = scmp.lt.s32.totalorder %s509_s28, %s509_s28 }
  0x2d   :  { %p516_p8 = por %p515_p7, %p514_p6 }
  0x2f   :  { %p517_p9 = pnand %p516_p8, %p510_p5 }
  0x31   :  { %520 = shalt.err (!%p517_p9)
}
  0x32   :  { %s554_s0 = smov 64   ;;  %s555_s21 = smov 4  }
  0x33   :  { %50 = dma.hbm_to_vmem [thread:$0]  %s658_s3, 2048, %s45_s19, [#allocation6], %s554_s0, %s554_s0, %s555_s21  }
  0x34   :  { %543 = dma.done.wait [#allocation3], 256  }
  0x35   :  { %544 = vsyncadd [#allocation3], 4294967040 }
  0x36   :  { %545 = dma.done.wait [#allocation6], 2560  }
  0x37   :  { %546 = vsyncadd [#allocation6], 4294964736  ;;  %v556_v0 = vmov 0   ;;  %v429_v1 = vld [vmem:[#allocation5 + $0x4] ss:$8 sps:$4 sm:$0xff]   ;;  %v63_v5 = vld [vmem:[#allocation2] sm:$0xff]  ;;  %v72_v24 = vlaneseq }
  0x38   :  { %138 = vmatprep.mubr.bf16.mxu0 %v556_v0  ;;  %v431_v2 = vld [vmem:[#allocation5] ss:$8 sps:$4 sm:$0xff]   ;;  %106 = vmatprep.subr.bf16.mxu0 %v429_v1  ;;  %v432_v3 = vld [vmem:[#allocation5 + $0x14] ss:$8 sps:$4 sm:$0xff]   ;;  %v434_v4 = vld [vmem:[#allocation5 + $0x10] ss:$8 sps:$4 sm:$0xff]  }
  0x39   :  { %107 = vmatpush1.bf16.msra.mxu0 %v431_v2  ;;  %v64_v6 = vld [vmem:[#allocation2 + $0x8] sm:$0xff]  ;;  %v435_v7 = vld [vmem:[#allocation7 + $0x40] sm:$0xff]   ;;  %v437_v10 = vld [vmem:[#allocation7 + $0x48] sm:$0xff]   ;;  %vm102_vm0 = vcmask 261120   ;;  %v73_v25 = vshrl.u32 %v72_v24, 7  ;;  %s557_s8 = smov [#allocation8]  }
  0x3a   :  { %108 = vmatprep.subr.bf16.mxu0 %v432_v3  ;;  %v436_v8 = vld [vmem:[#allocation7] sm:$0xff]   ;;  %v65_v9 = vpack.c.bf16 %v64_v6, %v63_v5  ;;  %398 = vmatprep.subr.bf16.mxu1 %v435_v7  ;;  %v438_v11 = vld [vmem:[#allocation7 + $0x8] sm:$0xff]   ;;  %v439_v12 = vld [vmem:[#allocation7 + $0x50] sm:$0xff]   ;;  %s354_s9 = sshll.u32 %s557_s8, 4  ;;  %s355_s9 = int_to_ptr.vmem [resolvable:$true] %s354_s9 }
  0x3b   :  { %399 = vmatpush3.bf16.msra.mxu1 %v436_v8  ;;  %v440_v13 = vld [vmem:[#allocation7 + $0x10] sm:$0xff]   ;;  %v441_v14 = vld [vmem:[#allocation7 + $0x58] sm:$0xff]   ;;  %v443_v16 = vld [vmem:[#allocation7 + $0x60] sm:$0xff]   ;;  %v74_v26 = vsub.s32 0, %v73_v25  ;;  %v78_v28 = vsub.s32 1, %v73_v25  ;;  %p526_p11 = scmp.lt.s32.totalorder %s355_s9, %s355_s9 }
  0x3c   :  { %400 = vmatprep.subr.bf16.mxu1 %v437_v10  ;;  %v442_v15 = vld [vmem:[#allocation7 + $0x18] sm:$0xff]   ;;  %v444_v17 = vld [vmem:[#allocation7 + $0x20] sm:$0xff]   ;;  %v445_v18 = vld [vmem:[#allocation7 + $0x68] sm:$0xff]  }
  0x3d   :  { %109 = vmatpush1.bf16.msra.mxu0 %v434_v4  ;;  %v446_v19 = vld [vmem:[#allocation7 + $0x28] sm:$0xff]   ;;  %v447_v20 = vld [vmem:[#allocation7 + $0x70] sm:$0xff]   ;;  %v449_v22 = vld [vmem:[#allocation7 + $0x78] sm:$0xff]  }
  0x3e   :  { %v448_v21 = vld [vmem:[#allocation7 + $0x30] sm:$0xff]   ;;  %v450_v23 = vld [vmem:[#allocation7 + $0x38] sm:$0xff]  }
  0x3f   :  { %401 = vmatpush3.bf16.msra.mxu1 %v438_v11  ;;  %v70_v27 = vld [vmem:[%s657_s2] sm:$0x3] }
  0x40   :  { %371 = vmatmul.mubr.msk.bf16.vlgmr.msra.gmra.mrb[0].mxu0 %vm102_vm0, %v65_v9  ;;  %402 = vmatprep.subr.bf16.mxu1 %v439_v12  ;;  %v75_v29 = vrot.slane %v70_v27, %v74_v26  ;;  %v79_v30 = vrot.slane %v70_v27, %v78_v28  ;;  %v372_v46 = vld [vmem:[%s659_s4] ss:$0 sm:$0xff]  ;;  %s521_s4 = scalar_lea.vmem %s355_s9, 128 }
  0x41   :  { %p522_p10 = scmp.ne.s32.totalorder %s355_s9, %s521_s4  ;;  %p527_p12 = scmp.lt.s32.totalorder %s521_s4, %s521_s4 }
  0x43   :  { %403 = vmatpush3.bf16.msra.mxu1 %v440_v13  ;;  %p528_p13 = por %p527_p12, %p526_p11 }
  0x44   :  { %404 = vmatprep.subr.bf16.mxu1 %v441_v14 }
  0x45   :  { %p529_p0 = pnand %p528_p13, %p522_p10 }
  0x47   :  { %405 = vmatpush3.bf16.msra.mxu1 %v442_v15 }
  0x48   :  { %406 = vmatprep.subr.bf16.mxu1 %v443_v16 }
  0x4b   :  { %407 = vmatpush3.bf16.msra.mxu1 %v444_v17 }
  0x4c   :  { %408 = vmatprep.subr.bf16.mxu1 %v445_v18 }
  0x4f   :  { %409 = vmatpush3.bf16.msra.mxu1 %v446_v19 }
  0x50   :  { %410 = vmatprep.subr.bf16.mxu1 %v447_v20 }
  0x53   :  { %411 = vmatpush3.bf16.msra.mxu1 %v448_v21 }
  0x54   :  { %412 = vmatprep.subr.bf16.mxu1 %v449_v22 }
  0x57   :  { %413 = vmatpush3.bf16.msra.mxu1 %v450_v23 }
 0x113   :  { %v140_v31 = vpop.f32.mrb[0].mxu0 }
 0x114   :  { %v141_v32 = vadd.f32 %v140_v31, %v75_v29  ;;  %v142_v33 = vpop.f32.mrb[1].mxu0 }
 0x115   :  { %v143_v34 = vadd.f32 %v142_v33, %v79_v30  ;;  %v144_v35 = vpop.f32.mrb[2].mxu0 }
 0x116   :  { %v145_v36 = vadd.f32 %v144_v35, %v75_v29  ;;  %v146_v37 = vpop.f32.mrb[3].mxu0  ;;  %v149_v39 = vmax.f32 %v141_v32, 0.0 }
 0x117   :  { %v147_v38 = vadd.f32 %v146_v37, %v79_v30  ;;  %v150_v41 = vmax.f32 %v143_v34, 0.0 }
 0x118   :  { %v151_v40 = vmax.f32 %v145_v36, 0.0 }
 0x119   :  { %v152_v42 = vmax.f32 %v147_v38, 0.0 }
 0x11a   :  { %v153_v43 = vpack.c.bf16 %v151_v40, %v149_v39 }
 0x11b   :  { %v154_v44 = vpack.c.bf16 %v152_v42, %v150_v41 }
 0x11d   :  { %322 = vmatprep.mubr.bf16.mxu1 %v154_v44 }
 0x11e   :  { %323 = vmatmul.mubr.bf16.vlgmr.msra.gmra.mrb[0].mxu1 %v153_v43 }
 0x1f1   :  { %v414_v45 = vpop.f32.mrb[0].mxu1 }
 0x1f2   :  { %v415_v47 = vpop.f32.mrb[1].mxu1 }
 0x1f3   :  { %v416_v48 = vadd.f32 %v415_v47, %v414_v45  ;;  %v417_v49 = vpop.f32.mrb[2].mxu1 }
 0x1f4   :  { %v418_v50 = vpop.f32.mrb[3].mxu1 }
 0x1f5   :  { %v325_v51 = vadd.f32 %v416_v48, %v372_v46  ;;  %v419_v52 = vadd.f32 %v418_v50, %v417_v49 }
 0x1f7   :  { %v331_v53 = vmul.f32 0.5, %v325_v51  ;;  %v328_v54 = vadd.f32 %v419_v52, %v372_v46 }
 0x1f9   :  { %451 = vtanh.f32 %v331_v53  ;;  %v332_v55 = vmul.f32 0.5, %v328_v54 }
 0x1fb   :  { %453 = vtanh.f32 %v332_v55 }
 0x203   :  { %v452_v56 = vpop.eup %451 }
 0x204   :  { %v335_v57 = vmul.f32 0.5, %v452_v56 }
 0x205   :  { %v454_v58 = vpop.eup %453 }
 0x206   :  { %v336_v59 = vmul.f32 0.5, %v454_v58  ;;  %v337_v60 = vadd.f32 0.5, %v335_v57 }
 0x208   :  { %v338_v61 = vadd.f32 0.5, %v336_v59 }
 0x20a   :  { %v396_v62 = vpack.c.bf16 %v338_v61, %v337_v60 }
 0x20c   :  { %397 = vst [vmem:[#allocation8] sm:$0xff] %v396_v62  }
 0x20d   :  { %532 = shalt.err (!%p529_p0)
}
 0x20e   :  { %s533_s12 = scalar_lea.hbm %s660_s5, 128 }
 0x20f   :  { %p534_p1 = scmp.ne.s32.totalorder %s660_s5, %s533_s12  ;;  %p537_p2 = scmp.lt.u32.totalorder %s533_s12, %s660_s5 }
 0x211   :  { %p539_p3 = pnand %p537_p2, %p534_p1 }
 0x213   :  { %542 = shalt.err (!%p539_p3)
}
 0x214   :  { %360 = dma.vmem_to_hbm [thread:$0]  %s355_s9, 128, %s660_s5, [#allocation4], %s554_s0, %s554_s0, %s555_s21  }
 0x215   :  { %547 = dma.done.wait [#allocation4], 128  }
 0x216   :  { %548 = vsyncadd [#allocation4], 4294967168 }
 0x217   :  { %364 = vsyncpa [#allocation3], 1 }
 0x218   :  { %365 = vsyncpa [#allocation6], 1 }
 0x219   :  { %366 = vsyncpa [#allocation4], 1 }

</bundles_post_ra>
